<compile_context>
chip_gen: v7x
topology: tpu7x:2x2x1
jax: 0.10.0
libtpu: 0.0.40
codegen_flags: <defaults>
</compile_context>

<pallas_src>
import functools

import jax
import jax.numpy as jnp
from jax.experimental import pallas as pl
from jax.experimental.pallas import tpu as pltpu

IN_F = 64
OUT_F = 32
PACK = 4                        # logical rows packed per lane-dense packed row
PIN = PACK * IN_F               # 256  (matmul K)
POUT = PACK * OUT_F             # 128  (matmul N -> unmasked full-lane 128 stores)
BN_EPS = 1e-5
LEAKY_SLOPE = 0.01

NCORES = 2                          # v7x has 2 TensorCores; extra grid dim is harmless elsewhere
RESIDENT_Y_MAX = 20 * 1024 * 1024   # fused path keeps y resident in VMEM up to this many bytes
VMEM_CAP = 48 * 1024 * 1024         # safe ceiling on v5e/v6e (128 MiB) and v7x (64 MiB) VMEM


def _round_up(a, m):
    return -(-a // m) * m


def _vmem_limit(tile_p, extra_bytes):
    """Size the VMEM limit from the actual footprint, not a flat constant (review: v5e item)."""
    x_buf = 2 * tile_p * PIN * 4        # x tile, double-buffered
    o_buf = 2 * tile_p * POUT * 4       # out tile, double-buffered
    consts = (PIN * POUT + 4 * POUT + POUT * POUT) * 4
    need = x_buf + o_buf + consts + extra_bytes
    return int(max(16 << 20, min(VMEM_CAP, need * 3 // 2 + (4 << 20))))


# --------------------------------------------------------------------------------------
# Fused single-kernel path: phase 0 (stats + resident y), phase 1 (BN affine + LeakyReLU)
# --------------------------------------------------------------------------------------
def _fused_call(xp, wbd, gb, *, np_valid, inv_n, tile_p, n_tiles):
    np_rows = xp.shape[0]
    y_bytes = n_tiles * tile_p * POUT * 4

    def kernel(xp_ref, wbd_ref, gb_ref, fold_ref, o_ref, acc_ref, ss_ref, y_ref):
        p = pl.program_id(0)               # phase: 0 = stats, 1 = apply
        i = pl.program_id(1)               # row tile
        start = pl.multiple_of(i * tile_p, 8)

        @pl.when(jnp.logical_and(p == 0, i == 0))
        def _init():
            acc_ref[...] = jnp.zeros_like(acc_ref)

        @pl.when(p == 0)
        def _stats():
            y = jnp.dot(xp_ref[...], wbd_ref[...], preferred_element_type=jnp.float32)
            # Mask the ragged last tile's garbage rows (no host-side padding of x).
            row = jax.lax.broadcasted_iota(jnp.int32, y.shape, 0) + start
            ym = jnp.where(row < np_valid, y, 0.0)
            acc_ref[0:1, :] += jnp.sum(ym, axis=0, keepdims=True)
            acc_ref[1:2, :] += jnp.sum(ym * ym, axis=0, keepdims=True)
            y_ref[pl.ds(start, tile_p), :] = y          # stash y in the resident VMEM scratch

        @pl.when(jnp.logical_and(p == 1, i == 0))
        def _boundary():
            # Fold the 4 packed groups: (acc @ fold)[r, l] = total over groups for feature l%32,
            # already replicated across all 4 groups (so it can be applied to packed y directly).
            folded = jnp.dot(acc_ref[...], fold_ref[...], preferred_element_type=jnp.float32)
            mean = folded[0:1, :] * inv_n
            var = folded[1:2, :] * inv_n - mean * mean
            scale = gb_ref[0:1, :] * jax.lax.rsqrt(var + BN_EPS)
            ss_ref[0:1, :] = scale
            # Linear bias is cancelled exactly by the BN mean subtraction.
            ss_ref[1:2, :] = gb_ref[1:2, :] - mean * scale

        @pl.when(p == 1)
        def _apply():
            z = y_ref[pl.ds(start, tile_p), :] * ss_ref[0:1, :] + ss_ref[1:2, :]
            o_ref[...] = jnp.where(z >= 0, z, LEAKY_SLOPE * z).astype(o_ref.dtype)

    # (128, 128) fold matrix: fold[i, j] = 1 if i % 32 == j % 32 else 0.
    lane = jnp.arange(POUT, dtype=jnp.int32)
    fold = (lane[:, None] % OUT_F == lane[None, :] % OUT_F).astype(jnp.float32)

    return pl.pallas_call(
        kernel,
        out_shape=jax.ShapeDtypeStruct((np_rows, POUT), jnp.float32),
        grid=(2, n_tiles),
        in_specs=[
            # Phase 0 walks the tiles; phase 1 parks on the last tile -> x is read exactly once.
            pl.BlockSpec((tile_p, PIN), lambda p, i: (i + p * (n_tiles - 1 - i), 0)),
            pl.BlockSpec((PIN, POUT), lambda p, i: (0, 0)),     # block-diagonal weight, resident
            pl.BlockSpec((2, POUT), lambda p, i: (0, 0)),       # packed gamma / beta
            pl.BlockSpec((POUT, POUT), lambda p, i: (0, 0)),    # group-fold matrix
        ],
        # Output block stays at 0 through phase 0 (never written back), then follows the tiles.
        out_specs=pl.BlockSpec((tile_p, POUT), lambda p, i: (p * i, 0)),
        scratch_shapes=[
            pltpu.VMEM((2, POUT), jnp.float32),                 # sum(y) / sum(y*y)
            pltpu.VMEM((2, POUT), jnp.float32),                 # folded BN scale / shift
            pltpu.VMEM((n_tiles * tile_p, POUT), jnp.float32),  # VMEM-resident y
        ],
        compiler_params=pltpu.CompilerParams(
            dimension_semantics=("arbitrary", "arbitrary"),
            vmem_limit_bytes=_vmem_limit(tile_p, y_bytes)),
    )(xp, wbd, gb, fold)


# --------------------------------------------------------------------------------------
# Two-pass fallback for large N (y does not fit VMEM): pass 1 stats (core-split), pass 2 apply
# --------------------------------------------------------------------------------------
def _two_pass_call(xp, wbd, gamma, beta, *, np_valid, inv_n, tile_p, n_tiles):
    np_rows = xp.shape[0]
    tiles_per_core = -(-n_tiles // NCORES)
    vmem = _vmem_limit(tile_p, 0)

    def stats_kernel(xp_ref, wbd_ref, acc_ref):
        c = pl.program_id(0)
        i = pl.program_id(1)

        @pl.when(i == 0)
        def _init():
            acc_ref[...] = jnp.zeros_like(acc_ref)

        y = jnp.dot(xp_ref[...], wbd_ref[...], preferred_element_type=jnp.float32)
        g0 = (c * tiles_per_core + i) * tile_p           # unclamped global packed-row offset
        row = jax.lax.broadcasted_iota(jnp.int32, y.shape, 0) + g0
        ym = jnp.where(row < np_valid, y, 0.0)           # masks ragged + duplicated tiles
        acc_ref[0:1, :] += jnp.sum(ym, axis=0, keepdims=True)
        acc_ref[1:2, :] += jnp.sum(ym * ym, axis=0, keepdims=True)

    acc = pl.pallas_call(
        stats_kernel,
        out_shape=jax.ShapeDtypeStruct((NCORES, 2, POUT), jnp.float32),
        grid=(NCORES, tiles_per_core),
        in_specs=[
            pl.BlockSpec((tile_p, PIN),
                         lambda c, i: (jnp.minimum(c * tiles_per_core + i, n_tiles - 1), 0)),
            pl.BlockSpec((PIN, POUT), lambda c, i: (0, 0)),
        ],
        out_specs=pl.BlockSpec((None, 2, POUT), lambda c, i: (c, 0, 0)),  # per-core accumulator
        compiler_params=pltpu.CompilerParams(
            dimension_semantics=("parallel", "arbitrary"),   # shards the x read over v7x's 2 TCs
            vmem_limit_bytes=vmem),
    )(xp, wbd)

    # Tiny (32,)-sized epilogue: fold cores + packed groups, fold BN into scale / shift.
    s = jnp.sum(acc, axis=0)                              # (2, 128)
    s1 = s[0].reshape(PACK, OUT_F).sum(axis=0)
    s2 = s[1].reshape(PACK, OUT_F).sum(axis=0)
    mean = s1 * inv_n
    var = s2 * inv_n - mean * mean
    scale = gamma * jax.lax.rsqrt(var + BN_EPS)
    shift = beta - mean * scale                           # Linear bias cancels against BN mean
    ss = jnp.concatenate([jnp.tile(scale, PACK)[None, :],
                          jnp.tile(shift, PACK)[None, :]], axis=0)   # (2, 128)

    def apply_kernel(xp_ref, wbd_ref, ss_ref, o_ref):
        y = jnp.dot(xp_ref[...], wbd_ref[...], preferred_element_type=jnp.float32)
        z = y * ss_ref[0:1, :] + ss_ref[1:2, :]
        o_ref[...] = jnp.where(z >= 0, z, LEAKY_SLOPE * z).astype(o_ref.dtype)

    return pl.pallas_call(
        apply_kernel,
        out_shape=jax.ShapeDtypeStruct((np_rows, POUT), jnp.float32),
        grid=(n_tiles,),
        in_specs=[
            pl.BlockSpec((tile_p, PIN), lambda i: (i, 0)),
            pl.BlockSpec((PIN, POUT), lambda i: (0, 0)),
            pl.BlockSpec((2, POUT), lambda i: (0, 0)),
        ],
        out_specs=pl.BlockSpec((tile_p, POUT), lambda i: (i, 0)),
        compiler_params=pltpu.CompilerParams(
            dimension_semantics=("parallel",),
            vmem_limit_bytes=vmem),
    )(xp, wbd, ss)


# --------------------------------------------------------------------------------------
# Wrapper
# --------------------------------------------------------------------------------------
@functools.partial(jax.jit, static_argnames=("tile_rows_packed", "force_two_pass"))
def dsfe_forward(x, w, b, gamma, beta, *, tile_rows_packed=2048, force_two_pass=False):
    """x: (N, 64) f32; w: (32, 64); b/gamma/beta: (32,). Returns (N, 32) f32."""
    del b  # bias shifts cancel exactly under training-mode BatchNorm
    n = x.shape[0]
    x = x.astype(jnp.float32)

    # Zero-copy packing: (N, 64) -> (N/4, 256) is a bitcast-equivalent reshape (no HBM copy).
    # Only N % 4 != 0 pays a small pad copy; the padded zero rows contribute exactly 0 to the
    # batch statistics (bias is never added inside the kernels) and are sliced off at the end.
    if n % PACK:
        x = jnp.pad(x, ((0, PACK - n % PACK), (0, 0)))
    np_rows = x.shape[0] // PACK
    xp = x.reshape(np_rows, PIN)

    tile_req = _round_up(max(8, int(tile_rows_packed)), 8)   # clamp override to a multiple of 8
    tile_p = min(tile_req, _round_up(np_rows, 8))
    n_tiles = pl.cdiv(np_rows, tile_p)
    np_valid = np_rows               # packed rows that hold real (or zero-padded) data
    inv_n = 1.0 / n                  # normalize stats by the true batch size

    wt = w.astype(jnp.float32).T                                   # (64, 32)
    wbd = jnp.kron(jnp.eye(PACK, dtype=jnp.float32), wt)          # (256, 128) block-diagonal
    gamma_f = gamma.astype(jnp.float32)
    beta_f = beta.astype(jnp.float32)

    y_bytes = n_tiles * tile_p * POUT * 4
    if (not force_two_pass) and y_bytes <= RESIDENT_Y_MAX:
        gb = jnp.concatenate([jnp.tile(gamma_f, PACK)[None, :],
                              jnp.tile(beta_f, PACK)[None, :]], axis=0)   # (2, 128)
        out_p = _fused_call(xp, wbd, gb, np_valid=np_valid, inv_n=inv_n,
                            tile_p=tile_p, n_tiles=n_tiles)
    else:
        out_p = _two_pass_call(xp, wbd, gamma_f, beta_f, np_valid=np_valid, inv_n=inv_n,
                               tile_p=tile_p, n_tiles=n_tiles)

    return out_p.reshape(np_rows * PACK, OUT_F)[:n]


def reference_forward(x, w, b, gamma, beta):
    y = x @ w.T + b
    mean = jnp.mean(y, axis=0, keepdims=True)
    var = jnp.mean((y - mean) ** 2, axis=0, keepdims=True)
    y_bn = (y - mean) * jax.lax.rsqrt(var + BN_EPS) * gamma + beta
    return jnp.where(y_bn >= 0, y_bn, LEAKY_SLOPE * y_bn)


if __name__ == "__main__":
    key = jax.random.PRNGKey(0)
    kx, kw, kb, kg, kbe = jax.random.split(key, 5)

    N = 256
    # Round the matmul operands to bf16-representable values so the MXU result is directly
    # comparable to the XLA reference at tight tolerance regardless of either side's
    # matmul-precision default (accumulation is f32 in both). Kernel math itself stays f32.
    x = jax.random.normal(kx, (N, IN_F), dtype=jnp.float32).astype(jnp.bfloat16).astype(jnp.float32)
    bound = 1.0 / (IN_F ** 0.5)
    w = jax.random.uniform(kw, (OUT_F, IN_F), jnp.float32, -bound, bound
                           ).astype(jnp.bfloat16).astype(jnp.float32)
    b = jax.random.uniform(kb, (OUT_F,), jnp.float32, -bound, bound)
    gamma = 1.0 + 0.1 * jax.random.normal(kg, (OUT_F,), dtype=jnp.float32)
    beta = 0.1 * jax.random.normal(kbe, (OUT_F,), dtype=jnp.float32)

    ref = reference_forward(x, w, b, gamma, beta)

    # 1) Default path: fused single kernel (stats phase + apply phase, y resident in VMEM).
    out = jax.block_until_ready(dsfe_forward(x, w, b, gamma, beta))
    assert out.shape == (N, OUT_F)
    assert jnp.allclose(out, ref, atol=1e-4, rtol=1e-4), "mismatch (fused, single tile)"

    # 2) Ragged batch (N % 4 != 0) + multi-tile fused path (exercises in-kernel masking).
    N2 = 250
    x2 = x[:N2]
    ref2 = reference_forward(x2, w, b, gamma, beta)
    out2 = jax.block_until_ready(dsfe_forward(x2, w, b, gamma, beta, tile_rows_packed=16))
    assert out2.shape == (N2, OUT_F)
    assert jnp.allclose(out2, ref2, atol=1e-4, rtol=1e-4), "mismatch (fused, multi-tile, ragged N)"

    # 3) Two-pass fallback (used automatically when y would not fit the VMEM budget),
    #    including the 2-core-split stats grid.
    out3 = jax.block_until_ready(
        dsfe_forward(x, w, b, gamma, beta, tile_rows_packed=16, force_two_pass=True))
    assert jnp.allclose(out3, ref, atol=1e-4, rtol=1e-4), "mismatch (two-pass fallback)"

    print("KERNEL_OK")
</pallas_src>

<mosaic_0001>
module attributes {stable_mosaic.version = 11 : i64} {
  func.func @kernel(%arg0: i32, %arg1: i32, %arg2: memref<64x256xf32, #tpu.memory_space<vmem>>, %arg3: memref<256x128xf32, #tpu.memory_space<vmem>>, %arg4: memref<2x128xf32, #tpu.memory_space<vmem>>, %arg5: memref<128x128xf32, #tpu.memory_space<vmem>>, %arg6: memref<64x128xf32, #tpu.memory_space<vmem>>, %arg7: memref<2x128xf32, #tpu.memory_space<vmem>>, %arg8: memref<2x128xf32, #tpu.memory_space<vmem>>, %arg9: memref<64x128xf32, #tpu.memory_space<vmem>>) attributes {dimension_semantics = [#tpu.dimension_semantics<arbitrary>, #tpu.dimension_semantics<arbitrary>], iteration_bounds = array<i64: 2, 1>, scalar_prefetch = 0 : i64, scratch_operands = 3 : i64, tpu.core_type = #tpu.core_type<tc>, window_params = [{transform_indices = @transform_0, window_bounds = array<i64: 64, 256>}, {pipeline_mode = #tpu.pipeline_mode<synchronous>, transform_indices = @transform_1, window_bounds = array<i64: 256, 128>}, {pipeline_mode = #tpu.pipeline_mode<synchronous>, transform_indices = @transform_2, window_bounds = array<i64: 2, 128>}, {pipeline_mode = #tpu.pipeline_mode<synchronous>, transform_indices = @transform_3, window_bounds = array<i64: 128, 128>}, {transform_indices = @transform_4, window_bounds = array<i64: 64, 128>}]} {
    %c64_i32 = arith.constant 64 : i32
    %0 = arith.muli %arg1, %c64_i32 : i32
    %1 = tpu.assume_multiple %0, 8 : i32
    %c0_i32 = arith.constant 0 : i32
    %2 = arith.cmpi eq, %arg0, %c0_i32 : i32
    %c0_i32_0 = arith.constant 0 : i32
    %3 = arith.cmpi eq, %arg1, %c0_i32_0 : i32
    %4 = arith.andi %2, %3 : i1
    %5 = arith.extui %4 : i1 to i32
    %c0_i32_1 = arith.constant 0 : i32
    %6 = arith.cmpi ne, %5, %c0_i32_1 : i32
    scf.if %6 {
      %cst = arith.constant 0.000000e+00 : f32
      %18 = vector.broadcast %cst : f32 to vector<2x128xf32>
      %c0 = arith.constant 0 : index
      %c0_8 = arith.constant 0 : index
      %19 = vector.load %arg7[%c0, %c0_8] : memref<2x128xf32, #tpu.memory_space<vmem>>, vector<2x128xf32>
      tpu.vector_store %arg7[%c0, %c0_8], %18 {strides = array<i32>} : memref<2x128xf32, #tpu.memory_space<vmem>>, vector<2x128xf32>,
    } else {
    }
    %c0_i32_2 = arith.constant 0 : i32
    %7 = arith.cmpi eq, %arg0, %c0_i32_2 : i32
    %8 = arith.extui %7 : i1 to i32
    %c0_i32_3 = arith.constant 0 : i32
    %9 = arith.cmpi ne, %8, %c0_i32_3 : i32
    scf.if %9 {
      %c0 = arith.constant 0 : index
      %c0_8 = arith.constant 0 : index
      %18 = vector.load %arg2[%c0, %c0_8] : memref<64x256xf32, #tpu.memory_space<vmem>>, vector<64x256xf32>
      %c0_9 = arith.constant 0 : index
      %c0_10 = arith.constant 0 : index
      %19 = vector.load %arg3[%c0_9, %c0_10] : memref<256x128xf32, #tpu.memory_space<vmem>>, vector<256x128xf32>
      %cst = arith.constant dense<0.000000e+00> : vector<64x128xf32>
      %20 = tpu.matmul %18, %19, %cst {dimension_numbers = #tpu.dot_dimension_numbers<[1], [0], [0], [1], [0, 0, 1, 1], [], []>} : vector<64x256xf32>, vector<256x128xf32>, vector<64x128xf32> -> vector<64x128xf32>
      %21 = tpu.iota {dimensions = array<i32: 0>} : vector<64x128xi32>
      %22 = vector.broadcast %1 : i32 to vector<64x128xi32>
      %23 = arith.addi %21, %22 : vector<64x128xi32>
      %c64_i32_11 = arith.constant 64 : i32
      %24 = vector.broadcast %c64_i32_11 : i32 to vector<64x128xi32>
      %25 = arith.cmpi slt, %23, %24 : vector<64x128xi32>
      %cst_12 = arith.constant 0.000000e+00 : f32
      %26 = vector.broadcast %cst_12 : f32 to vector<64x128xf32>
      %27 = arith.select %25, %20, %26 : vector<64x128xi1>, vector<64x128xf32>
      %c0_13 = arith.constant 0 : index
      %c0_14 = arith.constant 0 : index
      %28 = vector.load %arg7[%c0_13, %c0_14] : memref<2x128xf32, #tpu.memory_space<vmem>>, vector<1x128xf32>
      %cst_15 = arith.constant dense<0.000000e+00> : vector<128xf32>
      %29 = vector.multi_reduction <add>, %27, %cst_15 [0] : vector<64x128xf32> to vector<128xf32>
      %30 = vector.shape_cast %29 : vector<128xf32> to vector<1x128xf32>
      %31 = arith.addf %28, %30 : vector<1x128xf32>
      %c0_16 = arith.constant 0 : index
      %c0_17 = arith.constant 0 : index
      %32 = vector.load %arg7[%c0_16, %c0_17] : memref<2x128xf32, #tpu.memory_space<vmem>>, vector<1x128xf32>
      tpu.vector_store %arg7[%c0_16, %c0_17], %31 {strides = array<i32>} : memref<2x128xf32, #tpu.memory_space<vmem>>, vector<1x128xf32>,
      %c1 = arith.constant 1 : index
      %c0_18 = arith.constant 0 : index
      %33 = vector.load %arg7[%c1, %c0_18] : memref<2x128xf32, #tpu.memory_space<vmem>>, vector<1x128xf32>
      %34 = arith.mulf %27, %27 : vector<64x128xf32>
      %cst_19 = arith.constant dense<0.000000e+00> : vector<128xf32>
      %35 = vector.multi_reduction <add>, %34, %cst_19 [0] : vector<64x128xf32> to vector<128xf32>
      %36 = vector.shape_cast %35 : vector<128xf32> to vector<1x128xf32>
      %37 = arith.addf %33, %36 : vector<1x128xf32>
      %c1_20 = arith.constant 1 : index
      %c0_21 = arith.constant 0 : index
      %38 = vector.load %arg7[%c1_20, %c0_21] : memref<2x128xf32, #tpu.memory_space<vmem>>, vector<1x128xf32>
      tpu.vector_store %arg7[%c1_20, %c0_21], %37 {strides = array<i32>} : memref<2x128xf32, #tpu.memory_space<vmem>>, vector<1x128xf32>,
      %39 = arith.index_cast %1 : i32 to index
      %c0_22 = arith.constant 0 : index
      %40 = vector.load %arg9[%39, %c0_22] : memref<64x128xf32, #tpu.memory_space<vmem>>, vector<64x128xf32>
      tpu.vector_store %arg9[%39, %c0_22], %20 {strides = array<i32>} : memref<64x128xf32, #tpu.memory_space<vmem>>, vector<64x128xf32>,
    } else {
    }
    %c1_i32 = arith.constant 1 : i32
    %10 = arith.cmpi eq, %arg0, %c1_i32 : i32
    %c0_i32_4 = arith.constant 0 : i32
    %11 = arith.cmpi eq, %arg1, %c0_i32_4 : i32
    %12 = arith.andi %10, %11 : i1
    %13 = arith.extui %12 : i1 to i32
    %c0_i32_5 = arith.constant 0 : i32
    %14 = arith.cmpi ne, %13, %c0_i32_5 : i32
    scf.if %14 {
      %c0 = arith.constant 0 : index
      %c0_8 = arith.constant 0 : index
      %18 = vector.load %arg7[%c0, %c0_8] : memref<2x128xf32, #tpu.memory_space<vmem>>, vector<2x128xf32>
      %c0_9 = arith.constant 0 : index
      %c0_10 = arith.constant 0 : index
      %19 = vector.load %arg5[%c0_9, %c0_10] : memref<128x128xf32, #tpu.memory_space<vmem>>, vector<128x128xf32>
      %cst = arith.constant dense<0.000000e+00> : vector<2x128xf32>
      %20 = tpu.matmul %18, %19, %cst {dimension_numbers = #tpu.dot_dimension_numbers<[1], [0], [0], [1], [0, 0, 1, 1], [], []>} : vector<2x128xf32>, vector<128x128xf32>, vector<2x128xf32> -> vector<2x128xf32>
      %21 = vector.extract_strided_slice %20 {offsets = [0, 0], sizes = [1, 128], strides = [1, 1]} : vector<2x128xf32> to vector<1x128xf32>
      %cst_11 = arith.constant 3.906250e-03 : f32
      %22 = vector.broadcast %cst_11 : f32 to vector<1x128xf32>
      %23 = arith.mulf %21, %22 : vector<1x128xf32>
      %24 = vector.extract_strided_slice %20 {offsets = [1, 0], sizes = [1, 128], strides = [1, 1]} : vector<2x128xf32> to vector<1x128xf32>
      %cst_12 = arith.constant 3.906250e-03 : f32
      %25 = vector.broadcast %cst_12 : f32 to vector<1x128xf32>
      %26 = arith.mulf %24, %25 : vector<1x128xf32>
      %27 = arith.mulf %23, %23 : vector<1x128xf32>
      %28 = arith.subf %26, %27 : vector<1x128xf32>
      %c0_13 = arith.constant 0 : index
      %c0_14 = arith.constant 0 : index
      %29 = vector.load %arg4[%c0_13, %c0_14] : memref<2x128xf32, #tpu.memory_space<vmem>>, vector<1x128xf32>
      %cst_15 = arith.constant 9.99999974E-6 : f32
      %30 = vector.broadcast %cst_15 : f32 to vector<1x128xf32>
      %31 = arith.addf %28, %30 : vector<1x128xf32>
      %32 = math.rsqrt %31 : vector<1x128xf32>
      %33 = arith.mulf %29, %32 : vector<1x128xf32>
      %c0_16 = arith.constant 0 : index
      %c0_17 = arith.constant 0 : index
      %34 = vector.load %arg8[%c0_16, %c0_17] : memref<2x128xf32, #tpu.memory_space<vmem>>, vector<1x128xf32>
      tpu.vector_store %arg8[%c0_16, %c0_17], %33 {strides = array<i32>} : memref<2x128xf32, #tpu.memory_space<vmem>>, vector<1x128xf32>,
      %c1 = arith.constant 1 : index
      %c0_18 = arith.constant 0 : index
      %35 = vector.load %arg4[%c1, %c0_18] : memref<2x128xf32, #tpu.memory_space<vmem>>, vector<1x128xf32>
      %36 = arith.mulf %23, %33 : vector<1x128xf32>
      %37 = arith.subf %35, %36 : vector<1x128xf32>
      %c1_19 = arith.constant 1 : index
      %c0_20 = arith.constant 0 : index
      %38 = vector.load %arg8[%c1_19, %c0_20] : memref<2x128xf32, #tpu.memory_space<vmem>>, vector<1x128xf32>
      tpu.vector_store %arg8[%c1_19, %c0_20], %37 {strides = array<i32>} : memref<2x128xf32, #tpu.memory_space<vmem>>, vector<1x128xf32>,
    } else {
    }
    %c1_i32_6 = arith.constant 1 : i32
    %15 = arith.cmpi eq, %arg0, %c1_i32_6 : i32
    %16 = arith.extui %15 : i1 to i32
    %c0_i32_7 = arith.constant 0 : i32
    %17 = arith.cmpi ne, %16, %c0_i32_7 : i32
    scf.if %17 {
      %18 = arith.index_cast %1 : i32 to index
      %c0 = arith.constant 0 : index
      %19 = vector.load %arg9[%18, %c0] : memref<64x128xf32, #tpu.memory_space<vmem>>, vector<64x128xf32>
      %c0_8 = arith.constant 0 : index
      %c0_9 = arith.constant 0 : index
      %20 = vector.load %arg8[%c0_8, %c0_9] : memref<2x128xf32, #tpu.memory_space<vmem>>, vector<1x128xf32>
      %21 = vector.broadcast %20 : vector<1x128xf32> to vector<64x128xf32>
      %22 = arith.mulf %19, %21 : vector<64x128xf32>
      %c1 = arith.constant 1 : index
      %c0_10 = arith.constant 0 : index
      %23 = vector.load %arg8[%c1, %c0_10] : memref<2x128xf32, #tpu.memory_space<vmem>>, vector<1x128xf32>
      %24 = vector.broadcast %23 : vector<1x128xf32> to vector<64x128xf32>
      %25 = arith.addf %22, %24 : vector<64x128xf32>
      %cst = arith.constant 0.000000e+00 : f32
      %26 = vector.broadcast %cst : f32 to vector<64x128xf32>
      %27 = arith.cmpf oge, %25, %26 : vector<64x128xf32>
      %cst_11 = arith.constant 0.00999999977 : f32
      %28 = vector.broadcast %cst_11 : f32 to vector<64x128xf32>
      %29 = arith.mulf %28, %25 : vector<64x128xf32>
      %30 = arith.select %27, %25, %29 : vector<64x128xi1>, vector<64x128xf32>
      %c0_12 = arith.constant 0 : index
      %c0_13 = arith.constant 0 : index
      %31 = vector.load %arg6[%c0_12, %c0_13] : memref<64x128xf32, #tpu.memory_space<vmem>>, vector<64x128xf32>
      tpu.vector_store %arg6[%c0_12, %c0_13], %30 {strides = array<i32>} : memref<64x128xf32, #tpu.memory_space<vmem>>, vector<64x128xf32>,
    } else {
    }
    return
  }
  func.func @transform_0(%arg0: i32, %arg1: i32) -> (i32, i32) {
    %c0_i32 = arith.constant 0 : i32
    %0 = arith.subi %c0_i32, %arg1 : i32
    %1 = arith.muli %arg0, %0 : i32
    %2 = arith.addi %arg1, %1 : i32
    %c0_i32_0 = arith.constant 0 : i32
    %c0_i32_1 = arith.constant 0 : i32
    return %2, %c0_i32_0 : i32, i32
  }
  func.func @transform_1(%arg0: i32, %arg1: i32) -> (i32, i32) {
    %c0_i32 = arith.constant 0 : i32
    %c0_i32_0 = arith.constant 0 : i32
    %c0_i32_1 = arith.constant 0 : i32
    return %c0_i32, %c0_i32_0 : i32, i32
  }
  func.func @transform_2(%arg0: i32, %arg1: i32) -> (i32, i32) {
    %c0_i32 = arith.constant 0 : i32
    %c0_i32_0 = arith.constant 0 : i32
    %c0_i32_1 = arith.constant 0 : i32
    return %c0_i32, %c0_i32_0 : i32, i32
  }
  func.func @transform_3(%arg0: i32, %arg1: i32) -> (i32, i32) {
    %c0_i32 = arith.constant 0 : i32
    %c0_i32_0 = arith.constant 0 : i32
    %c0_i32_1 = arith.constant 0 : i32
    return %c0_i32, %c0_i32_0 : i32, i32
  }
  func.func @transform_4(%arg0: i32, %arg1: i32) -> (i32, i32) {
    %0 = arith.muli %arg0, %arg1 : i32
    %c0_i32 = arith.constant 0 : i32
    %c0_i32_0 = arith.constant 0 : i32
    return %0, %c0_i32 : i32, i32
  }
}

</mosaic_0001>

<bundles_post_ra>
// kernel: tile.13
= control target key start
LH: loop header
LB: loop body
LE: loop exit
PB: predicated region body
PF: predicated region fallthrough
CT: control target
= control target key end

     0   :  { %s22_s0 = inlined_call_operand.vmem [shape: f32[32], index: 0, kind: input, shape index: {}]   ;;  %s23_s1 = inlined_call_operand.vmem [shape: f32[4,32], index: 1, kind: output, shape index: {}]  }
   0x1   :  { %v4_v0 = vld [vmem:[%s22_s0] ss:$0 sm:$0xff] }
   0x2   :  { %5 = vst [vmem:[%s23_s1] sm:$0xf] %v4_v0 }

// kernel: tile.14
= control target key start
LH: loop header
LB: loop body
LE: loop exit
PB: predicated region body
PF: predicated region fallthrough
CT: control target
= control target key end

     0   :  { %vm7_vm0 = vcmask 261120   ;;  %s37_s8 = smov 32   ;;  %s38_s9 = smov 64   ;;  %vm13_vm1 = vcmask 1048320   ;;  %vm19_vm2 = vcmask 785920   ;;  %vm25_vm3 = vcmask 523520   ;;  %s55_s0 = inlined_call_operand.vmem [shape: f32[4,32], index: 0, kind: input, shape index: {}]   ;;  %s56_s1 = inlined_call_operand.vmem [shape: f32[1,128], index: 1, kind: output, shape index: {}]  }
   0x1   :  { %v4_v0 = vld [vmem:[%s55_s0] sm:$0xf]  ;;  %s36_s0 = smov 96  }
   0x2   :  { %5 = vst [vmem:[#allocation1] sm:$0xf] %v4_v0 }
   0x9   :  { %v10_v1 = vld [vmem:[#allocation1 + $0x3] sm:$0x1]   ;;  %v22_v2 = vld [vmem:[#allocation1 + $0x1] sm:$0x1]   ;;  %v6_v3 = vld [vmem:[#allocation1] sm:$0x1]  }
   0xa   :  { %11 = vrot.lane.b32.xlu0 %v10_v1, %s36_s0  ;;  %23 = vrot.lane.b32.xlu1 %v22_v2, %s37_s8  ;;  %v16_v4 = vld [vmem:[#allocation1 + $0x2] sm:$0x1]   ;;  %8 = vst.msk [vmem:[#allocation0] sm:$0x1] %vm7_vm0, %v6_v3  }
   0xe   :  { %17 = vrot.lane.b32.xlu0 %v16_v4, %s38_s9 }
  0x7c   :  { %v12_v5 = vpop.permute.xlu0 %11   ;;  %v24_v6 = vpop.permute.xlu1 %23  }
  0x7d   :  { %14 = vst.msk [vmem:[#allocation0] sm:$0x1] %vm13_vm1, %v12_v5  }
  0x80   :  { %v18_v7 = vpop.permute.xlu0 %17  }
  0x81   :  { %20 = vst.msk [vmem:[#allocation0] sm:$0x1] %vm19_vm2, %v18_v7  }
  0x82   :  { %26 = vst.msk [vmem:[#allocation0] sm:$0x1] %vm25_vm3, %v24_v6  }
  0x89   :  { %v30_v8 = vld [vmem:[#allocation0] sm:$0x1] }
  0x8a   :  { %32 = vst [vmem:[%s56_s1] sm:$0x1] %v30_v8 }

// kernel: dsfe_forward.1
= control target key start
LH: loop header
LB: loop body
LE: loop exit
PB: predicated region body
PF: predicated region fallthrough
CT: control target
= control target key end

     0   :  { %s1022_s15 = smov 0   ;;  %s1024_s16 = smov 0   ;;  %s1277_s0 = inlined_call_operand.vmem [shape: f32[64,256], index: 0, kind: input, shape index: {}]   ;;  %s1278_s1 = inlined_call_operand.vmem [shape: f32[256,128], index: 1, kind: input, shape index: {}]   ;;  %s1279_s2 = inlined_call_operand.vmem [shape: f32[2,128], index: 2, kind: input, shape index: {}]   ;;  %s1280_s3 = inlined_call_operand.vmem [shape: f32[128,128], index: 3, kind: input, shape index: {}]   ;;  %s1281_s4 = inlined_call_operand.vmem [shape: f32[64,128], index: 4, kind: output, shape index: {}]  }
   0x1   :  { %s1026_s17 = smov 0  }
   0x2 LB: > { %s26_s18 = sadd.s32 1, %s987_s16  ;;  %p746_p0 = scmp.ge.s32.totalorder %s991_s17, 1  ;;  %s991_s17 = sphi %s1026_s17, %s14_s17   ;;  %s987_s16 = sphi %s1024_s16, %s1283_s16   ;;  %s983_s15 = sphi %s1022_s15, %s1282_s15  }
   0x3   : > { %p28_p1 = scmp.ge.s32.totalorder %s26_s18, 2  ;;  %p190_p2 = scmp.lt.s32.totalorder %s991_s17, 3 }
   0x5   : > { %s1285_s18 = smov (%p28_p1, %s26_s18), 0  ;;  %p191_p3 = pnand %p746_p0, %p190_p2 }
   0x6   : > { %p243_p4 = scmp.eq.s32.totalorder (!%p191_p3), %s983_s15, 0 }
   0x7   : > { %194 = sbr.rel (%p191_p3) target bundleno = 606 (0x25e), region = 36 }
   0xe   : > { %248 = sbr.rel (!%p243_p4) target bundleno = 21 (0x15), region = 40  ;;  %v993_v0 = vmov (%p243_p4), 0.0  }
   0xf   : > { %249 = vst [vmem:[#allocation2] sm:$0x3] (%p243_p4), %v993_v0 }
  0x15 PF: > { %p748_p5 = scmp.ne.s32.totalorder %s983_s15, 0 }
  0x16   : > { %v285_v1 = vld [vmem:[%s1278_s1 + $0x80] sm:$0xff] (!%p748_p5)  ;;  %v286_v2 = vld [vmem:[%s1278_s1 + $0x88] sm:$0xff] (!%p748_p5)  ;;  %v287_v6 = vld [vmem:[%s1278_s1 + $0x90] sm:$0xff] (!%p748_p5) }
  0x17   : > { %252 = sbr.rel (%p748_p5) target bundleno = 311 (0x137), region = 44  ;;  %v269_v3 = vld [vmem:[%s1278_s1] sm:$0xff] (!%p748_p5)  ;;  %v867_v4 = vpack.c.bf16 (!%p748_p5), %v286_v2, %v285_v1  ;;  %v270_v5 = vld [vmem:[%s1278_s1 + $0x8] sm:$0xff] (!%p748_p5)  ;;  %v288_v7 = vld [vmem:[%s1278_s1 + $0x98] sm:$0xff] (!%p748_p5) }
  0x18   : > { %v869_v8 = vpack.c.bf16 (!%p748_p5), %v270_v5, %v269_v3  ;;  %v871_v9 = vpack.c.bf16 (!%p748_p5), %v288_v7, %v287_v6  ;;  %v271_v10 = vld [vmem:[%s1278_s1 + $0x10] sm:$0xff] (!%p748_p5)  ;;  %v272_v11 = vld [vmem:[%s1278_s1 + $0x18] sm:$0xff] (!%p748_p5)  ;;  %v289_v12 = vld [vmem:[%s1278_s1 + $0xa0] sm:$0xff] (!%p748_p5) }
  0x19   : > { %868 = vmatprep.subr.bf16.mxu0 (!%p748_p5), %v867_v4  ;;  %923 = vmatprep.subr.bf16.mxu1 (!%p748_p5), %v867_v4  ;;  %v290_v13 = vld [vmem:[%s1278_s1 + $0xa8] sm:$0xff] (!%p748_p5)  ;;  %v873_v14 = vpack.c.bf16 (!%p748_p5), %v272_v11, %v271_v10  ;;  %v273_v16 = vld [vmem:[%s1278_s1 + $0x20] sm:$0xff] (!%p748_p5)  ;;  %v291_v18 = vld [vmem:[%s1278_s1 + $0xb0] sm:$0xff] (!%p748_p5) }
  0x1a   : > { %870 = vmatpush3.bf16.msra.mxu0 (!%p748_p5), %v869_v8  ;;  %931 = vmatpush3.bf16.msra.mxu1 (!%p748_p5), %v869_v8  ;;  %v875_v15 = vpack.c.bf16 (!%p748_p5), %v290_v13, %v289_v12  ;;  %v274_v17 = vld [vmem:[%s1278_s1 + $0x28] sm:$0xff] (!%p748_p5)  ;;  %v292_v19 = vld [vmem:[%s1278_s1 + $0xb8] sm:$0xff] (!%p748_p5)  ;;  %v275_v22 = vld [vmem:[%s1278_s1 + $0x30] sm:$0xff] (!%p748_p5) }
  0x1b   : > { %872 = vmatprep.subr.bf16.mxu0 (!%p748_p5), %v871_v9  ;;  %924 = vmatprep.subr.bf16.mxu1 (!%p748_p5), %v871_v9  ;;  %v877_v20 = vpack.c.bf16 (!%p748_p5), %v274_v17, %v273_v16  ;;  %v879_v21 = vpack.c.bf16 (!%p748_p5), %v292_v19, %v291_v18  ;;  %v276_v23 = vld [vmem:[%s1278_s1 + $0x38] sm:$0xff] (!%p748_p5)  ;;  %v293_v24 = vld [vmem:[%s1278_s1 + $0xc0] sm:$0xff] (!%p748_p5)  ;;  %v294_v25 = vld [vmem:[%s1278_s1 + $0xc8] sm:$0xff] (!%p748_p5) }
  0x1c   : > { %v254_v26 = vld [vmem:[%s1277_s0 + $0x8] sm:$0xff] (!%p748_p5)  ;;  %v881_v27 = vpack.c.bf16 (!%p748_p5), %v276_v23, %v275_v22  ;;  %v883_v29 = vpack.c.bf16 (!%p748_p5), %v294_v25, %v293_v24  ;;  %v277_v30 = vld [vmem:[%s1278_s1 + $0x40] sm:$0xff] (!%p748_p5)  ;;  %v295_v32 = vld [vmem:[%s1278_s1 + $0xd0] sm:$0xff] (!%p748_p5) }
  0x1d   : > { %365 = vmatprep.mubr.f32.mxu0 (!%p748_p5), %v254_v26  ;;  %v262_v28 = vld [vmem:[%s1277_s0 + $0x48] sm:$0xff] (!%p748_p5)  ;;  %v296_v33 = vld [vmem:[%s1278_s1 + $0xd8] sm:$0xff] (!%p748_p5)  ;;  %v279_v36 = vld [vmem:[%s1278_s1 + $0x50] sm:$0xff] (!%p748_p5) }
  0x1e   : > { %874 = vmatpush3.bf16.msra.mxu0 %v873_v14  ;;  %932 = vmatpush3.bf16.msra.mxu1 %v873_v14  ;;  %v278_v31 = vld [vmem:[%s1278_s1 + $0x48] sm:$0xff]  ;;  %v887_v35 = vpack.c.bf16 %v296_v33, %v295_v32  ;;  %v280_v37 = vld [vmem:[%s1278_s1 + $0x58] sm:$0xff]  ;;  %v297_v38 = vld [vmem:[%s1278_s1 + $0xe0] sm:$0xff] }
  0x1f   : > { %876 = vmatprep.subr.bf16.mxu0 %v875_v15  ;;  %925 = vmatprep.subr.bf16.mxu1 %v875_v15  ;;  %v885_v34 = vpack.c.bf16 %v278_v31, %v277_v30  ;;  %v298_v39 = vld [vmem:[%s1278_s1 + $0xe8] sm:$0xff]  ;;  %v889_v40 = vpack.c.bf16 %v280_v37, %v279_v36  ;;  %v281_v42 = vld [vmem:[%s1278_s1 + $0x60] sm:$0xff]  ;;  %v299_v44 = vld [vmem:[%s1278_s1 + $0xf0] sm:$0xff] }
  0x20   : > { %385 = vmatprep.mubr.f32.mxu1 %v262_v28  ;;  %v891_v41 = vpack.c.bf16 %v298_v39, %v297_v38  ;;  %v282_v43 = vld [vmem:[%s1278_s1 + $0x68] sm:$0xff]  ;;  %v300_v45 = vld [vmem:[%s1278_s1 + $0xf8] sm:$0xff]  ;;  %v283_v48 = vld [vmem:[%s1278_s1 + $0x70] sm:$0xff] }
  0x21   : > { %v893_v46 = vpack.c.bf16 %v282_v43, %v281_v42  ;;  %v895_v47 = vpack.c.bf16 %v300_v45, %v299_v44  ;;  %v284_v49 = vld [vmem:[%s1278_s1 + $0x78] sm:$0xff]  ;;  %v253_v51 = vld [vmem:[%s1277_s0] sm:$0xff]  ;;  %v255_v55 = vld [vmem:[%s1277_s0 + $0x10] sm:$0xff] }
  0x22   : > { %878 = vmatpush3.bf16.msra.mxu0 %v877_v20  ;;  %933 = vmatpush3.bf16.msra.mxu1 %v877_v20  ;;  %v897_v50 = vpack.c.bf16 %v284_v49, %v283_v48  ;;  %v261_v52 = vld [vmem:[%s1277_s0 + $0x40] sm:$0xff]  ;;  %v256_v53 = vld [vmem:[%s1277_s0 + $0x18] sm:$0xff]  ;;  %v263_v56 = vld [vmem:[%s1277_s0 + $0x50] sm:$0xff] }
  0x23   : > { %880 = vmatprep.subr.bf16.mxu0 %v879_v21  ;;  %926 = vmatprep.subr.bf16.mxu1 %v879_v21  ;;  %v264_v54 = vld [vmem:[%s1277_s0 + $0x58] sm:$0xff]  ;;  %v258_v57 = vld [vmem:[%s1277_s0 + $0x28] sm:$0xff]  ;;  %v257_v59 = vld [vmem:[%s1277_s0 + $0x20] sm:$0xff] }
  0x24   : > { %v266_v58 = vld [vmem:[%s1277_s0 + $0x68] sm:$0xff]  ;;  %v265_v60 = vld [vmem:[%s1277_s0 + $0x60] sm:$0xff]  ;;  %v260_v61 = vld [vmem:[%s1277_s0 + $0x38] sm:$0xff] }
  0x25   : > { %v268_v62 = vld [vmem:[%s1277_s0 + $0x78] sm:$0xff]  ;;  %v259_v63 = vld [vmem:[%s1277_s0 + $0x30] sm:$0xff] }
  0x26   : > { %882 = vmatpush3.bf16.msra.mxu0 %v881_v27  ;;  %934 = vmatpush3.bf16.msra.mxu1 %v881_v27  ;;  %v267_v0 = vld [vmem:[%s1277_s0 + $0x70] sm:$0xff] }
  0x27   : > { %884 = vmatprep.subr.bf16.mxu0 %v883_v29  ;;  %927 = vmatprep.subr.bf16.mxu1 %v883_v29 }
  0x2a   : > { %886 = vmatpush3.bf16.msra.mxu0 %v885_v34  ;;  %935 = vmatpush3.bf16.msra.mxu1 %v885_v34 }
  0x2b   : > { %888 = vmatprep.subr.bf16.mxu0 %v887_v35  ;;  %928 = vmatprep.subr.bf16.mxu1 %v887_v35 }
  0x2e   : > { %890 = vmatpush3.bf16.msra.mxu0 %v889_v40  ;;  %936 = vmatpush3.bf16.msra.mxu1 %v889_v40 }
  0x2f   : > { %892 = vmatprep.subr.bf16.mxu0 %v891_v41  ;;  %929 = vmatprep.subr.bf16.mxu1 %v891_v41 }
  0x32   : > { %894 = vmatpush3.bf16.msra.mxu0 %v893_v46  ;;  %937 = vmatpush3.bf16.msra.mxu1 %v893_v46 }
  0x33   : > { %896 = vmatprep.subr.bf16.mxu0 %v895_v47  ;;  %930 = vmatprep.subr.bf16.mxu1 %v895_v47 }
  0x36   : > { %898 = vmatpush3.bf16.msra.mxu0 %v897_v50  ;;  %938 = vmatpush3.bf16.msra.mxu1 %v897_v50 }
  0x39   : > { %366 = vmatmul.mubr.f32.vlgmr.msra.gmra.mrb[0].mxu0 %v253_v51  ;;  %386 = vmatmul.mubr.f32.vlgmr.msra.gmra.mrb[0].mxu1 %v261_v52 }
  0x3a   : > { %370 = vmatprep.mubr.f32.mxu0 %v256_v53  ;;  %390 = vmatprep.mubr.f32.mxu1 %v264_v54 }
  0x3d   : > { %371 = vmatmul.mubr.f32.gmra.mrb[2].mxu0 %v255_v55  ;;  %391 = vmatmul.mubr.f32.gmra.mrb[2].mxu1 %v263_v56  ;;  %v440_v56 = vld [vmem:[#allocation2] sm:$0x1] }
  0x3e   : > { %375 = vmatprep.mubr.f32.mxu0 %v258_v57  ;;  %395 = vmatprep.mubr.f32.mxu1 %v266_v58 }
  0x41   : > { %376 = vmatmul.mubr.f32.gmra.mrb[4].mxu0 %v257_v59  ;;  %396 = vmatmul.mubr.f32.gmra.mrb[4].mxu1 %v265_v60  ;;  %v456_v59 = vld [vmem:[#allocation2 + $0x1] sm:$0x1] }
  0x42   : > { %380 = vmatprep.mubr.f32.mxu0 %v260_v61  ;;  %400 = vmatprep.mubr.f32.mxu1 %v268_v62 }
  0x45   : > { %381 = vmatmul.mubr.f32.gmra.mrb[6].mxu0 %v259_v63  ;;  %401 = vmatmul.mubr.f32.gmra.mrb[6].mxu1 %v267_v0 }
 0x10c   : > { %v791_v1 = vpop.f32.mrb[0].mxu0  ;;  %v803_v2 = vpop.f32.mrb[0].mxu1 }
 0x10d   : > { %v792_v3 = vpop.f32.mrb[1].mxu0  ;;  %v804_v4 = vpop.f32.mrb[1].mxu1 }
 0x10e   : > { %v793_v5 = vadd.f32 %v792_v3, %v791_v1  ;;  %v805_v6 = vadd.f32 %v804_v4, %v803_v2 }
 0x110   : > { %481 = vst [vmem:[#allocation4] sm:$0xff] %v793_v5  ;;  %v794_v7 = vpop.f32.mrb[2].mxu0  ;;  %485 = vst [vmem:[#allocation4 + $0x20] sm:$0xff] %v805_v6  ;;  %v806_v8 = vpop.f32.mrb[2].mxu1  ;;  %v457_v13 = vmul.f32 %v793_v5, %v793_v5  ;;  %v461_v34 = vmul.f32 %v805_v6, %v805_v6 }
 0x111   : > { %v795_v9 = vpop.f32.mrb[3].mxu0  ;;  %v807_v10 = vpop.f32.mrb[3].mxu1 }
 0x112   : > { %v796_v11 = vadd.f32 %v795_v9, %v794_v7  ;;  %v808_v12 = vadd.f32 %v807_v10, %v806_v8 }
 0x114   : > { %v441_v14 = vadd.f32 %v796_v11, %v793_v5  ;;  %v458_v15 = vmul.f32 %v796_v11, %v796_v11  ;;  %482 = vst [vmem:[#allocation4 + $0x8] sm:$0xff] %v796_v11  ;;  %v797_v16 = vpop.f32.mrb[4].mxu0  ;;  %486 = vst [vmem:[#allocation4 + $0x28] sm:$0xff] %v808_v12  ;;  %v809_v17 = vpop.f32.mrb[4].mxu1  ;;  %v462_v37 = vmul.f32 %v808_v12, %v808_v12 }
 0x115   : > { %v798_v18 = vpop.f32.mrb[5].mxu0  ;;  %v810_v19 = vpop.f32.mrb[5].mxu1 }
 0x116   : > { %v465_v20 = vadd.f32 %v458_v15, %v457_v13  ;;  %v799_v21 = vadd.f32 %v798_v18, %v797_v16  ;;  %v811_v22 = vadd.f32 %v810_v19, %v809_v17 }
 0x118   : > { %v442_v23 = vadd.f32 %v799_v21, %v441_v14  ;;  %v459_v24 = vmul.f32 %v799_v21, %v799_v21  ;;  %483 = vst [vmem:[#allocation4 + $0x10] sm:$0xff] %v799_v21  ;;  %v800_v25 = vpop.f32.mrb[6].mxu0  ;;  %487 = vst [vmem:[#allocation4 + $0x30] sm:$0xff] %v811_v22  ;;  %v812_v26 = vpop.f32.mrb[6].mxu1  ;;  %v463_v41 = vmul.f32 %v811_v22, %v811_v22 }
 0x119   : > { %v801_v27 = vpop.f32.mrb[7].mxu0  ;;  %v813_v28 = vpop.f32.mrb[7].mxu1 }
 0x11a   : > { %v466_v29 = vadd.f32 %v465_v20, %v459_v24  ;;  %v802_v30 = vadd.f32 %v801_v27, %v800_v25  ;;  %v814_v31 = vadd.f32 %v813_v28, %v812_v26 }
 0x11c   : > { %v443_v32 = vadd.f32 %v802_v30, %v442_v23  ;;  %v460_v33 = vmul.f32 %v802_v30, %v802_v30  ;;  %484 = vst [vmem:[#allocation4 + $0x18] sm:$0xff] %v802_v30  ;;  %488 = vst [vmem:[#allocation4 + $0x38] sm:$0xff] %v814_v31  ;;  %v464_v43 = vmul.f32 %v814_v31, %v814_v31 }
 0x11e   : > { %v444_v35 = vadd.f32 %v805_v6, %v443_v32  ;;  %v467_v36 = vadd.f32 %v466_v29, %v460_v33 }
 0x120   : > { %v468_v38 = vadd.f32 %v467_v36, %v461_v34  ;;  %v445_v39 = vadd.f32 %v808_v12, %v444_v35 }
 0x122   : > { %v446_v40 = vadd.f32 %v811_v22, %v445_v39  ;;  %v469_v42 = vadd.f32 %v468_v38, %v462_v37 }
 0x124   : > { %v470_v44 = vadd.f32 %v469_v42, %v463_v41  ;;  %v447_v45 = vadd.f32 %v814_v31, %v446_v40 }
 0x126   : > { %v448_v46 = vrot.slane %v447_v45, 4  ;;  %v471_v47 = vadd.f32 %v470_v44, %v464_v43 }
 0x128   : > { %v449_v48 = vadd.f32 %v448_v46, %v447_v45  ;;  %v472_v49 = vrot.slane %v471_v47, 4 }
 0x12a   : > { %v450_v50 = vrot.slane %v449_v48, 2  ;;  %v473_v51 = vadd.f32 %v472_v49, %v471_v47 }
 0x12c   : > { %v451_v52 = vadd.f32 %v450_v50, %v449_v48  ;;  %v474_v53 = vrot.slane %v473_v51, 2 }
 0x12e   : > { %v452_v54 = vrot.slane %v451_v52, 1  ;;  %v475_v55 = vadd.f32 %v474_v53, %v473_v51 }
 0x130   : > { %v453_v57 = vadd.f32 %v452_v54, %v451_v52  ;;  %v476_v58 = vrot.slane %v475_v55, 1 }
 0x132   : > { %v454_v60 = vadd.f32 %v453_v57, %v440_v56  ;;  %v477_v61 = vadd.f32 %v476_v58, %v475_v55 }
 0x134   : > { %455 = vst [vmem:[#allocation2] sm:$0x1] %v454_v60  ;;  %v478_v62 = vadd.f32 %v477_v61, %v456_v59 }
 0x136   : > { %479 = vst [vmem:[#allocation2 + $0x1] sm:$0x1] %v478_v62 }
 0x137 PF: > { %p489_p6 = scmp.eq.s32.totalorder %s983_s15, 1 }
 0x138   : > { %v495_v63 = vld [vmem:[%s1280_s3] sm:$0xff] (%p489_p6)  ;;  %v496_v0 = vld [vmem:[%s1280_s3 + $0x8] sm:$0xff] (%p489_p6)  ;;  %v497_v1 = vld [vmem:[%s1280_s3 + $0x10] sm:$0xff] (%p489_p6)  ;;  %v994_v2 = vmov (%p489_p6), 0.0|0.0   ;;  %vm995_vm0 = vmmov (%p489_p6), 0   ;;  %v996_v5 = vmov (%p489_p6), 0.0  }
 0x139   : > { %493 = sbr.rel (!%p489_p6) target bundleno = 588 (0x24c), region = 48  ;;  %899 = vmatprep.subr.bf16.mxu0 (%p489_p6), %v994_v2  ;;  %v900_v3 = vpack.c.bf16 (%p489_p6), %v496_v0, %v495_v63  ;;  %v498_v4 = vld [vmem:[%s1280_s3 + $0x18] sm:$0xff] (%p489_p6)  ;;  %864 = vmatprep.mubr.msk.f32.mxu0 (%p489_p6), %vm995_vm0, %v996_v5  ;;  %v499_v7 = vld [vmem:[%s1280_s3 + $0x20] sm:$0xff] (%p489_p6)  ;;  %v500_v8 = vld [vmem:[%s1280_s3 + $0x28] sm:$0xff] (%p489_p6) }
 0x13a   : > { %v903_v6 = vpack.c.bf16 (%p489_p6), %v498_v4, %v497_v1  ;;  %v906_v9 = vpack.c.bf16 (%p489_p6), %v500_v8, %v499_v7  ;;  %v501_v10 = vld [vmem:[%s1280_s3 + $0x30] sm:$0xff] (%p489_p6)  ;;  %v502_v11 = vld [vmem:[%s1280_s3 + $0x38] sm:$0xff] (%p489_p6)  ;;  %v503_v13 = vld [vmem:[%s1280_s3 + $0x40] sm:$0xff] (%p489_p6) }
 0x13b   : > { %901 = vmatpush3.bf16.msra.mxu0 (%p489_p6), %v900_v3  ;;  %v909_v12 = vpack.c.bf16 (%p489_p6), %v502_v11, %v501_v10  ;;  %v504_v14 = vld [vmem:[%s1280_s3 + $0x48] sm:$0xff] (%p489_p6)  ;;  %v505_v16 = vld [vmem:[%s1280_s3 + $0x50] sm:$0xff] (%p489_p6)  ;;  %v506_v17 = vld [vmem:[%s1280_s3 + $0x58] sm:$0xff] (%p489_p6) }
 0x13c   : > { %902 = vmatprep.subr.bf16.mxu0 (%p489_p6), %v994_v2  ;;  %v912_v15 = vpack.c.bf16 (%p489_p6), %v504_v14, %v503_v13  ;;  %v915_v18 = vpack.c.bf16 (%p489_p6), %v506_v17, %v505_v16  ;;  %v507_v19 = vld [vmem:[%s1280_s3 + $0x60] sm:$0xff] (%p489_p6)  ;;  %v508_v20 = vld [vmem:[%s1280_s3 + $0x68] sm:$0xff] (%p489_p6)  ;;  %v509_v22 = vld [vmem:[%s1280_s3 + $0x70] sm:$0xff] (%p489_p6) }
 0x13d   : > { %v918_v21 = vpack.c.bf16 (%p489_p6), %v508_v20, %v507_v19  ;;  %v510_v23 = vld [vmem:[%s1280_s3 + $0x78] sm:$0xff] (%p489_p6)  ;;  %v494_v25 = vld [vmem:[#allocation2] sm:$0x3] (%p489_p6) }
 0x13e   : > { %v921_v24 = vpack.c.bf16 (%p489_p6), %v510_v23, %v509_v22  ;;  %v587_v34 = vld [vmem:[%s1279_s2] sm:$0x1] (%p489_p6)  ;;  %v595_v37 = vld [vmem:[%s1279_s2 + $0x1] sm:$0x1] (%p489_p6) }
 0x13f   : > { %904 = vmatpush3.bf16.msra.mxu0 (%p489_p6), %v903_v6 }
 0x140   : > { %905 = vmatprep.subr.bf16.mxu0 %v994_v2 }
 0x143   : > { %907 = vmatpush3.bf16.msra.mxu0 %v906_v9 }
 0x144   : > { %908 = vmatprep.subr.bf16.mxu0 %v994_v2 }
 0x147   : > { %910 = vmatpush3.bf16.msra.mxu0 %v909_v12 }
 0x148   : > { %911 = vmatprep.subr.bf16.mxu0 %v994_v2 }
 0x14b   : > { %913 = vmatpush3.bf16.msra.mxu0 %v912_v15 }
 0x14c   : > { %914 = vmatprep.subr.bf16.mxu0 %v994_v2 }
 0x14f   : > { %916 = vmatpush3.bf16.msra.mxu0 %v915_v18 }
 0x150   : > { %917 = vmatprep.subr.bf16.mxu0 %v994_v2 }
 0x153   : > { %919 = vmatpush3.bf16.msra.mxu0 %v918_v21 }
 0x154   : > { %920 = vmatprep.subr.bf16.mxu0 %v994_v2 }
 0x157   : > { %922 = vmatpush3.bf16.msra.mxu0 %v921_v24 }
 0x15a   : > { %865 = vmatmul.mubr.f32.vlgmr.msra.gmra.mrb[0].mxu0 %v494_v25 }
 0x22d   : > { %v577_v26 = vpop.f32.mrb[0].mxu0 }
 0x22e   : > { %v581_v27 = vmul.f32 0.00390625, %v577_v26  ;;  %v866_v28 = vpop.f32.mrb[1].mxu0 }
 0x230   : > { %v582_v29 = vmul.f32 %v581_v27, %v581_v27 }
 0x232   : > { %v584_v30 = vrot.slane %v582_v29, 7 }
 0x234   : > { %v586_v31 = vsub.f32 %v581_v27, %v584_v30 }
 0x236   : > { %v588_v32 = vadd.f32 1e-05, %v586_v31 }
 0x238   : > { %967 = vrsqrt.f32 %v588_v32 }
 0x242   : > { %v968_v33 = vpop.eup %967 }
 0x243   : > { %v591_v35 = vrot.slane %v968_v33, 1 }
 0x245   : > { %v593_v36 = vmul.f32 %v591_v35, %v587_v34 }
 0x247   : > { %594 = vst [vmem:[#allocation3] sm:$0x1] %v593_v36  ;;  %v596_v38 = vmul.f32 %v593_v36, %v581_v27 }
 0x249   : > { %v597_v39 = vsub.f32 %v595_v37, %v596_v38 }
 0x24b   : > { %598 = vst [vmem:[#allocation3 + $0x1] sm:$0x1] %v597_v39 }
 0x24c PF: > { %p750_p7 = scmp.ne.s32.totalorder %s983_s15, 1 }
 0x24d   : > { %v603_v40 = vld [vmem:[#allocation4] sm:$0xff] (!%p750_p7)  ;;  %v604_v44 = vld [vmem:[#allocation4 + $0x8] sm:$0xff] (!%p750_p7)  ;;  %v605_v45 = vld [vmem:[#allocation4 + $0x10] sm:$0xff] (!%p750_p7) }
 0x24e   : > { %601 = sbr.rel (%p750_p7) target bundleno = 606 (0x25e), region = 52  ;;  %v751_v41 = vld [vmem:[#allocation3] ss:$0 sm:$0xff] (!%p750_p7)  ;;  %v607_v50 = vld [vmem:[#allocation4 + $0x20] sm:$0xff] (!%p750_p7)  ;;  %v608_v51 = vld [vmem:[#allocation4 + $0x28] sm:$0xff] (!%p750_p7) }
 0x24f   : > { %v616_v43 = vmul.f32 (!%p750_p7), %v751_v41, %v603_v40  ;;  %v606_v46 = vld [vmem:[#allocation4 + $0x18] sm:$0xff] (!%p750_p7)  ;;  %v617_v47 = vmul.f32 (!%p750_p7), %v751_v41, %v604_v44  ;;  %v618_v48 = vmul.f32 (!%p750_p7), %v751_v41, %v605_v45  ;;  %v609_v52 = vld [vmem:[#allocation4 + $0x30] sm:$0xff] (!%p750_p7)  ;;  %v620_v54 = vmul.f32 (!%p750_p7), %v751_v41, %v607_v50 }
 0x250   : > { %v619_v49 = vmul.f32 (!%p750_p7), %v751_v41, %v606_v46  ;;  %v621_v55 = vmul.f32 (!%p750_p7), %v751_v41, %v608_v51  ;;  %v622_v56 = vmul.f32 (!%p750_p7), %v751_v41, %v609_v52  ;;  %v610_v57 = vld [vmem:[#allocation4 + $0x38] sm:$0xff] (!%p750_p7) }
 0x251   : > { %v623_v61 = vmul.f32 (!%p750_p7), %v751_v41, %v610_v57 }
 0x252   : > { %v752_v42 = vld [vmem:[#allocation3 + $0x1] ss:$0 sm:$0xff] (!%p750_p7) }
 0x253   : > { %v629_v53 = vadd.f32 (!%p750_p7), %v752_v42, %v616_v43  ;;  %v630_v58 = vadd.f32 (!%p750_p7), %v752_v42, %v617_v47  ;;  %v631_v59 = vadd.f32 (!%p750_p7), %v752_v42, %v618_v48  ;;  %v632_v60 = vadd.f32 (!%p750_p7), %v752_v42, %v619_v49 }
 0x254   : > { %v633_v63 = vadd.f32 (!%p750_p7), %v752_v42, %v620_v54  ;;  %v634_v0 = vadd.f32 (!%p750_p7), %v752_v42, %v621_v55  ;;  %v635_v10 = vadd.f32 (!%p750_p7), %v752_v42, %v622_v56  ;;  %v636_v11 = vadd.f32 (!%p750_p7), %v752_v42, %v623_v61 }
 0x255   : > { %vm637_vm1 = vcmp.ge.f32.partialorder %v629_v53, 0.0  ;;  %v645_v62 = vmul.f32 0.01, %v629_v53  ;;  %vm638_vm2 = vcmp.ge.f32.partialorder %v630_v58, 0.0  ;;  %v646_v1 = vmul.f32 0.01, %v630_v58 }
 0x256   : > { %vm639_vm3 = vcmp.ge.f32.partialorder %v631_v59, 0.0  ;;  %v647_v2 = vmul.f32 0.01, %v631_v59  ;;  %vm640_vm4 = vcmp.ge.f32.partialorder %v632_v60, 0.0  ;;  %v648_v4 = vmul.f32 0.01, %v632_v60 }
 0x257   : > { %v653_v3 = vsel %vm637_vm1, %v629_v53, %v645_v62  ;;  %vm641_vm5 = vcmp.ge.f32.partialorder %v633_v63, 0.0  ;;  %v654_v5 = vsel %vm638_vm2, %v630_v58, %v646_v1  ;;  %v649_v7 = vmul.f32 0.01, %v633_v63 }
 0x258   : > { %661 = vst [vmem:[%s1281_s4] sm:$0xff] %v653_v3  ;;  %v655_v6 = vsel %vm639_vm3, %v631_v59, %v647_v2  ;;  %vm642_vm6 = vcmp.ge.f32.partialorder %v634_v0, 0.0  ;;  %662 = vst [vmem:[%s1281_s4 + $0x8] sm:$0xff] %v654_v5  ;;  %v656_v8 = vsel %vm640_vm4, %v632_v60, %v648_v4  ;;  %v650_v9 = vmul.f32 0.01, %v634_v0 }
 0x259   : > { %663 = vst [vmem:[%s1281_s4 + $0x10] sm:$0xff] %v655_v6  ;;  %664 = vst [vmem:[%s1281_s4 + $0x18] sm:$0xff] %v656_v8  ;;  %v657_v12 = vsel %vm641_vm5, %v633_v63, %v649_v7  ;;  %vm643_vm7 = vcmp.ge.f32.partialorder %v635_v10, 0.0  ;;  %v651_v14 = vmul.f32 0.01, %v635_v10  ;;  %vm644_vm8 = vcmp.ge.f32.partialorder %v636_v11, 0.0 }
 0x25a   : > { %665 = vst [vmem:[%s1281_s4 + $0x20] sm:$0xff] %v657_v12  ;;  %v658_v13 = vsel %vm642_vm6, %v634_v0, %v650_v9  ;;  %v652_v15 = vmul.f32 0.01, %v636_v11 }
 0x25b   : > { %666 = vst [vmem:[%s1281_s4 + $0x28] sm:$0xff] %v658_v13  ;;  %v659_v16 = vsel %vm643_vm7, %v635_v10, %v651_v14 }
 0x25c   : > { %667 = vst [vmem:[%s1281_s4 + $0x30] sm:$0xff] %v659_v16  ;;  %v660_v17 = vsel %vm644_vm8, %v636_v11, %v652_v15 }
 0x25d   : > { %668 = vst [vmem:[%s1281_s4 + $0x38] sm:$0xff] %v660_v17 }
 0x25e PF: > { %s14_s17 = sadd.s32 1, %s991_s17   ;;  %s1282_s15 = smov %s987_s16 }
 0x25f   : > { %p11_p8 = scmp.ge.s32.totalorder %s14_s17, 4   ;;  %s1283_s16 = smov %s1285_s18 }
 0x261   :  { %13 = sbr.rel (!%p11_p8) target bundleno = 2 (0x2), region = 84 }

</bundles_post_ra>
